<compile_context>
chip_gen: v7x
topology: tpu7x:2x2x1
jax: 0.10.0
libtpu: 0.0.40
codegen_flags: <defaults>
</compile_context>

<pallas_src>
import functools

import jax
import jax.numpy as jnp
from jax.experimental import pallas as pl
from jax.experimental.pallas import tpu as pltpu


DROPOUT_P = 0.2
LANE = 128                    # TPU lane width -> lane-dense output padding
MAX_TILE_N = 4096             # batch rows per grid step (biggest-that-fits rule)
_KEEP_THRESH_24 = int(round((1.0 - DROPOUT_P) * float(1 << 24)))   # P(keep) = 0.8


def _round_up(x, m):
    return (x + m - 1) // m * m


def _keep_mask(shape, seed_i32, row_start_i32, salt):
    """Bernoulli(keep=1-p) mask from a stateless integer hash (murmur3-fmix32 style).

    Only jnp/lax integer ops -> lowers on TPU (VPU) and in interpret mode.
    """
    rows = jax.lax.broadcasted_iota(jnp.int32, shape, 0) + row_start_i32
    cols = jax.lax.broadcasted_iota(jnp.int32, shape, 1)
    r = rows.astype(jnp.uint32)
    c = cols.astype(jnp.uint32)
    s = seed_i32.astype(jnp.uint32) + jnp.uint32(salt)

    x = r * jnp.uint32(0x9E3779B1)
    x = x ^ (c * jnp.uint32(0x85EBCA77))
    x = x + s
    x = x ^ (x >> jnp.uint32(16))
    x = x * jnp.uint32(0x85EBCA6B)
    x = x ^ (x >> jnp.uint32(13))
    x = x * jnp.uint32(0xC2B2AE35)
    x = x ^ (x >> jnp.uint32(16))

    r24 = (x >> jnp.uint32(8)).astype(jnp.int32)       # 24-bit uniform, non-negative
    return r24 < jnp.int32(_KEEP_THRESH_24)


def fcn_kernel(seed_ref,                      # scalar-prefetch (SMEM), shape (1,)
               x_ref, w1_ref, b1_ref,         # fc1
               w4_ref, b4_ref,                # fc4 (dropout-1 scale folded into w4)
               w5_ref, b5_ref,                # fc5 (dropout-2 scale folded in, lane padded)
               out_ref):
    tile_rows = x_ref.shape[0]
    row_start = pl.program_id(0) * tile_rows   # global row offset -> per-tile dropout mask
    seed = seed_ref[0]

    x = x_ref[...]

    # fc1 -> relu -> dropout(0.2)     (1/(1-p) folded into w4)
    h = jnp.dot(x, w1_ref[...], preferred_element_type=jnp.float32) + b1_ref[...]
    h = jnp.maximum(h, 0.0)
    h = jnp.where(_keep_mask(h.shape, seed, row_start, salt=0x0BAD_BEE1), h, 0.0)

    # fc4 -> relu -> dropout(0.2)     (1/(1-p) folded into w5)
    h = jnp.dot(h, w4_ref[...], preferred_element_type=jnp.float32) + b4_ref[...]
    h = jnp.maximum(h, 0.0)
    h = jnp.where(_keep_mask(h.shape, seed, row_start, salt=0x5EED_CAFE), h, 0.0)

    # fc5 -> lane-dense (tile_n, 128) store; wrapper slices [:, :num_classes]
    out = jnp.dot(h, w5_ref[...], preferred_element_type=jnp.float32) + b5_ref[...]
    out_ref[...] = out.astype(out_ref.dtype)


@functools.partial(jax.jit, static_argnames=("input_size", "num_classes"))
def fcn_forward(x, kernel_params, seed, *, input_size, num_classes):
    """x is reshaped to (-1, input_size), like torch's x.view(-1, input_size)."""
    x2d = x.reshape(-1, input_size).astype(jnp.float32)
    n = x2d.shape[0]
    w1, b1, w4, b4, w5, b5 = kernel_params
    hidden = w1.shape[1]
    mid = w4.shape[1]             # 23
    out_pad = w5.shape[1]         # round_up(num_classes, 128)

    # Batch tiling: rows -> sublanes.  Pad rows to a tile multiple (sliced off at the end).
    if n <= MAX_TILE_N:
        tile_n = max(8, _round_up(n, 8))
    else:
        tile_n = MAX_TILE_N
    n_pad = _round_up(n, tile_n)
    if n_pad != n:
        x2d = jnp.pad(x2d, ((0, n_pad - n), (0, 0)))
    num_tiles = n_pad // tile_n

    grid_spec = pltpu.PrefetchScalarGridSpec(
        num_scalar_prefetch=1,
        grid=(num_tiles,),
        in_specs=[
            pl.BlockSpec((tile_n, input_size), lambda i, s: (i, 0)),   # streamed x tile
            pl.BlockSpec((input_size, hidden), lambda i, s: (0, 0)),   # VMEM-resident weights
            pl.BlockSpec((1, hidden),          lambda i, s: (0, 0)),
            pl.BlockSpec((hidden, mid),        lambda i, s: (0, 0)),
            pl.BlockSpec((1, mid),             lambda i, s: (0, 0)),
            pl.BlockSpec((mid, out_pad),       lambda i, s: (0, 0)),
            pl.BlockSpec((1, out_pad),         lambda i, s: (0, 0)),
        ],
        out_specs=pl.BlockSpec((tile_n, out_pad), lambda i, s: (i, 0)),
    )

    out = pl.pallas_call(
        fcn_kernel,
        out_shape=jax.ShapeDtypeStruct((n_pad, out_pad), jnp.float32),
        grid_spec=grid_spec,
        compiler_params=pltpu.CompilerParams(
            dimension_semantics=("parallel",),        # shard batch tiles across TCs (v7x)
            vmem_limit_bytes=32 * 1024 * 1024,        # headroom for 4096-row tiles on v5e
        ),
    )(jnp.asarray(seed, dtype=jnp.int32).reshape((1,)),
      x2d, w1, b1, w4, b4, w5, b5)

    return out[:n, :num_classes]


def init_params(key, input_size, hidden_size, num_classes):
    """torch.nn.Linear default init: U(-1/sqrt(fan_in), 1/sqrt(fan_in)); W stored (out, in)."""
    def linear(k, fan_in, fan_out):
        kw, kb = jax.random.split(k)
        bound = 1.0 / jnp.sqrt(float(fan_in))
        w = jax.random.uniform(kw, (fan_out, fan_in), jnp.float32, -bound, bound)
        b = jax.random.uniform(kb, (fan_out,), jnp.float32, -bound, bound)
        return w, b

    k1, k4, k5 = jax.random.split(key, 3)
    w1, b1 = linear(k1, input_size, hidden_size)
    w4, b4 = linear(k4, hidden_size, 23)
    w5, b5 = linear(k5, 23, num_classes)
    return (w1, b1, w4, b4, w5, b5)


def prepare_params(params, num_classes):
    """One-time host-side prep: transpose to (in, out), fold the dropout keep-scale
    1/(1-p) into the *next* layer's weights (w4, w5), lane-pad fc5 to a 128 multiple."""
    w1, b1, w4, b4, w5, b5 = params
    scale = 1.0 / (1.0 - DROPOUT_P)
    out_pad = _round_up(max(num_classes, 1), LANE)

    w1t = jnp.asarray(w1, jnp.float32).T
    b1r = jnp.asarray(b1, jnp.float32).reshape(1, -1)
    w4t = jnp.asarray(w4, jnp.float32).T * scale          # absorbs dropout-1 scale
    b4r = jnp.asarray(b4, jnp.float32).reshape(1, -1)
    w5t = jnp.asarray(w5, jnp.float32).T * scale          # absorbs dropout-2 scale
    b5r = jnp.asarray(b5, jnp.float32).reshape(1, -1)

    w5p = jnp.zeros((w5t.shape[0], out_pad), jnp.float32).at[:, :num_classes].set(w5t)
    b5p = jnp.zeros((1, out_pad), jnp.float32).at[:, :num_classes].set(b5r)
    return (w1t, b1r, w4t, b4r, w5p, b5p)


if __name__ == "__main__":
    input_size = 64
    hidden_size = 32
    num_classes = 10

    key = jax.random.PRNGKey(0)
    kx, kp = jax.random.split(key)

    # x of shape (8, 8, 8) -> view(-1, 64) gives (8, 64)
    x = jax.random.normal(kx, (8, 8, 8), jnp.float32)
    params = init_params(kp, input_size, hidden_size, num_classes)
    kparams = prepare_params(params, num_classes)
    seed = jnp.int32(1234)

    out = fcn_forward(x, kparams, seed, input_size=input_size, num_classes=num_classes)
    out = jax.block_until_ready(out)

    assert out.shape == (8, num_classes), out.shape
    assert out.dtype == jnp.float32
    assert bool(jnp.all(jnp.isfinite(out)))
    print("KERNEL_OK")
</pallas_src>

<mosaic_0001>
module attributes {stable_mosaic.version = 11 : i64} {
  func.func @fcn_kernel(%arg0: i32, %arg1: memref<1xi32, #tpu.memory_space<smem>>, %arg2: memref<8x64xf32, #tpu.memory_space<vmem>>, %arg3: memref<64x32xf32, #tpu.memory_space<vmem>>, %arg4: memref<1x32xf32, #tpu.memory_space<vmem>>, %arg5: memref<32x23xf32, #tpu.memory_space<vmem>>, %arg6: memref<1x23xf32, #tpu.memory_space<vmem>>, %arg7: memref<23x128xf32, #tpu.memory_space<vmem>>, %arg8: memref<1x128xf32, #tpu.memory_space<vmem>>, %arg9: memref<8x128xf32, #tpu.memory_space<vmem>>) attributes {dimension_semantics = [#tpu.dimension_semantics<parallel>], iteration_bounds = array<i64: 1>, scalar_prefetch = 1 : i64, scratch_operands = 0 : i64, tpu.core_type = #tpu.core_type<tc>, window_params = [{transform_indices = @transform_0, window_bounds = array<i64: 8, 64>}, {pipeline_mode = #tpu.pipeline_mode<synchronous>, transform_indices = @transform_1, window_bounds = array<i64: 64, 32>}, {pipeline_mode = #tpu.pipeline_mode<synchronous>, transform_indices = @transform_2, window_bounds = array<i64: 1, 32>}, {pipeline_mode = #tpu.pipeline_mode<synchronous>, transform_indices = @transform_3, window_bounds = array<i64: 32, 23>}, {pipeline_mode = #tpu.pipeline_mode<synchronous>, transform_indices = @transform_4, window_bounds = array<i64: 1, 23>}, {pipeline_mode = #tpu.pipeline_mode<synchronous>, transform_indices = @transform_5, window_bounds = array<i64: 23, 128>}, {pipeline_mode = #tpu.pipeline_mode<synchronous>, transform_indices = @transform_6, window_bounds = array<i64: 1, 128>}, {transform_indices = @transform_7, window_bounds = array<i64: 8, 128>}]} {
    %c8_i32 = arith.constant 8 : i32
    %0 = arith.muli %arg0, %c8_i32 : i32
    %c0 = arith.constant 0 : index
    %1 = memref.load %arg1[%c0] : memref<1xi32, #tpu.memory_space<smem>>
    %c0_0 = arith.constant 0 : index
    %c0_1 = arith.constant 0 : index
    %2 = vector.load %arg2[%c0_0, %c0_1] : memref<8x64xf32, #tpu.memory_space<vmem>>, vector<8x64xf32>
    %c0_2 = arith.constant 0 : index
    %c0_3 = arith.constant 0 : index
    %3 = vector.load %arg3[%c0_2, %c0_3] : memref<64x32xf32, #tpu.memory_space<vmem>>, vector<64x32xf32>
    %cst = arith.constant dense<0.000000e+00> : vector<8x32xf32>
    %4 = tpu.matmul %2, %3, %cst {dimension_numbers = #tpu.dot_dimension_numbers<[1], [0], [0], [1], [0, 0, 1, 1], [], []>} : vector<8x64xf32>, vector<64x32xf32>, vector<8x32xf32> -> vector<8x32xf32>
    %c0_4 = arith.constant 0 : index
    %c0_5 = arith.constant 0 : index
    %5 = vector.load %arg4[%c0_4, %c0_5] : memref<1x32xf32, #tpu.memory_space<vmem>>, vector<1x32xf32>
    %6 = vector.broadcast %5 : vector<1x32xf32> to vector<8x32xf32>
    %7 = arith.addf %4, %6 : vector<8x32xf32>
    %cst_6 = arith.constant 0.000000e+00 : f32
    %8 = vector.broadcast %cst_6 : f32 to vector<8x32xf32>
    %9 = arith.maximumf %7, %8 : vector<8x32xf32>
    %10 = tpu.iota {dimensions = array<i32: 0>} : vector<8x32xi32>
    %11 = vector.broadcast %0 : i32 to vector<8x32xi32>
    %12 = arith.addi %10, %11 : vector<8x32xi32>
    %13 = tpu.iota {dimensions = array<i32: 1>} : vector<8x32xi32>
    %c195935969_i32 = arith.constant 195935969 : i32
    %14 = arith.addi %1, %c195935969_i32 : i32
    %c-1640531535_i32 = arith.constant -1640531535 : i32
    %15 = vector.broadcast %c-1640531535_i32 : i32 to vector<8x32xi32>
    %16 = arith.muli %12, %15 : vector<8x32xi32>
    %c-2048144777_i32 = arith.constant -2048144777 : i32
    %17 = vector.broadcast %c-2048144777_i32 : i32 to vector<8x32xi32>
    %18 = arith.muli %13, %17 : vector<8x32xi32>
    %19 = arith.xori %16, %18 : vector<8x32xi32>
    %20 = vector.broadcast %14 : i32 to vector<8x32xi32>
    %21 = arith.addi %19, %20 : vector<8x32xi32>
    %c16_i32 = arith.constant 16 : i32
    %22 = vector.broadcast %c16_i32 : i32 to vector<8x32xi32>
    %23 = arith.shrui %21, %22 : vector<8x32xi32>
    %24 = arith.xori %21, %23 : vector<8x32xi32>
    %c-2048144789_i32 = arith.constant -2048144789 : i32
    %25 = vector.broadcast %c-2048144789_i32 : i32 to vector<8x32xi32>
    %26 = arith.muli %24, %25 : vector<8x32xi32>
    %c13_i32 = arith.constant 13 : i32
    %27 = vector.broadcast %c13_i32 : i32 to vector<8x32xi32>
    %28 = arith.shrui %26, %27 : vector<8x32xi32>
    %29 = arith.xori %26, %28 : vector<8x32xi32>
    %c-1028477387_i32 = arith.constant -1028477387 : i32
    %30 = vector.broadcast %c-1028477387_i32 : i32 to vector<8x32xi32>
    %31 = arith.muli %29, %30 : vector<8x32xi32>
    %c16_i32_7 = arith.constant 16 : i32
    %32 = vector.broadcast %c16_i32_7 : i32 to vector<8x32xi32>
    %33 = arith.shrui %31, %32 : vector<8x32xi32>
    %34 = arith.xori %31, %33 : vector<8x32xi32>
    %c8_i32_8 = arith.constant 8 : i32
    %35 = vector.broadcast %c8_i32_8 : i32 to vector<8x32xi32>
    %36 = arith.shrui %34, %35 : vector<8x32xi32>
    %c13421773_i32 = arith.constant 13421773 : i32
    %37 = vector.broadcast %c13421773_i32 : i32 to vector<8x32xi32>
    %38 = arith.cmpi slt, %36, %37 : vector<8x32xi32>
    %cst_9 = arith.constant 0.000000e+00 : f32
    %39 = vector.broadcast %cst_9 : f32 to vector<8x32xf32>
    %40 = arith.select %38, %9, %39 : vector<8x32xi1>, vector<8x32xf32>
    %c0_10 = arith.constant 0 : index
    %c0_11 = arith.constant 0 : index
    %41 = vector.load %arg5[%c0_10, %c0_11] : memref<32x23xf32, #tpu.memory_space<vmem>>, vector<32x23xf32>
    %cst_12 = arith.constant dense<0.000000e+00> : vector<8x23xf32>
    %42 = tpu.matmul %40, %41, %cst_12 {dimension_numbers = #tpu.dot_dimension_numbers<[1], [0], [0], [1], [0, 0, 1, 1], [], []>} : vector<8x32xf32>, vector<32x23xf32>, vector<8x23xf32> -> vector<8x23xf32>
    %c0_13 = arith.constant 0 : index
    %c0_14 = arith.constant 0 : index
    %43 = vector.load %arg6[%c0_13, %c0_14] : memref<1x23xf32, #tpu.memory_space<vmem>>, vector<1x23xf32>
    %44 = vector.broadcast %43 : vector<1x23xf32> to vector<8x23xf32>
    %45 = arith.addf %42, %44 : vector<8x23xf32>
    %cst_15 = arith.constant 0.000000e+00 : f32
    %46 = vector.broadcast %cst_15 : f32 to vector<8x23xf32>
    %47 = arith.maximumf %45, %46 : vector<8x23xf32>
    %48 = tpu.iota {dimensions = array<i32: 0>} : vector<8x23xi32>
    %49 = vector.broadcast %0 : i32 to vector<8x23xi32>
    %50 = arith.addi %48, %49 : vector<8x23xi32>
    %51 = tpu.iota {dimensions = array<i32: 1>} : vector<8x23xi32>
    %c1592642302_i32 = arith.constant 1592642302 : i32
    %52 = arith.addi %1, %c1592642302_i32 : i32
    %c-1640531535_i32_16 = arith.constant -1640531535 : i32
    %53 = vector.broadcast %c-1640531535_i32_16 : i32 to vector<8x23xi32>
    %54 = arith.muli %50, %53 : vector<8x23xi32>
    %c-2048144777_i32_17 = arith.constant -2048144777 : i32
    %55 = vector.broadcast %c-2048144777_i32_17 : i32 to vector<8x23xi32>
    %56 = arith.muli %51, %55 : vector<8x23xi32>
    %57 = arith.xori %54, %56 : vector<8x23xi32>
    %58 = vector.broadcast %52 : i32 to vector<8x23xi32>
    %59 = arith.addi %57, %58 : vector<8x23xi32>
    %c16_i32_18 = arith.constant 16 : i32
    %60 = vector.broadcast %c16_i32_18 : i32 to vector<8x23xi32>
    %61 = arith.shrui %59, %60 : vector<8x23xi32>
    %62 = arith.xori %59, %61 : vector<8x23xi32>
    %c-2048144789_i32_19 = arith.constant -2048144789 : i32
    %63 = vector.broadcast %c-2048144789_i32_19 : i32 to vector<8x23xi32>
    %64 = arith.muli %62, %63 : vector<8x23xi32>
    %c13_i32_20 = arith.constant 13 : i32
    %65 = vector.broadcast %c13_i32_20 : i32 to vector<8x23xi32>
    %66 = arith.shrui %64, %65 : vector<8x23xi32>
    %67 = arith.xori %64, %66 : vector<8x23xi32>
    %c-1028477387_i32_21 = arith.constant -1028477387 : i32
    %68 = vector.broadcast %c-1028477387_i32_21 : i32 to vector<8x23xi32>
    %69 = arith.muli %67, %68 : vector<8x23xi32>
    %c16_i32_22 = arith.constant 16 : i32
    %70 = vector.broadcast %c16_i32_22 : i32 to vector<8x23xi32>
    %71 = arith.shrui %69, %70 : vector<8x23xi32>
    %72 = arith.xori %69, %71 : vector<8x23xi32>
    %c8_i32_23 = arith.constant 8 : i32
    %73 = vector.broadcast %c8_i32_23 : i32 to vector<8x23xi32>
    %74 = arith.shrui %72, %73 : vector<8x23xi32>
    %c13421773_i32_24 = arith.constant 13421773 : i32
    %75 = vector.broadcast %c13421773_i32_24 : i32 to vector<8x23xi32>
    %76 = arith.cmpi slt, %74, %75 : vector<8x23xi32>
    %cst_25 = arith.constant 0.000000e+00 : f32
    %77 = vector.broadcast %cst_25 : f32 to vector<8x23xf32>
    %78 = arith.select %76, %47, %77 : vector<8x23xi1>, vector<8x23xf32>
    %c0_26 = arith.constant 0 : index
    %c0_27 = arith.constant 0 : index
    %79 = vector.load %arg7[%c0_26, %c0_27] : memref<23x128xf32, #tpu.memory_space<vmem>>, vector<23x128xf32>
    %cst_28 = arith.constant dense<0.000000e+00> : vector<8x128xf32>
    %80 = tpu.matmul %78, %79, %cst_28 {dimension_numbers = #tpu.dot_dimension_numbers<[1], [0], [0], [1], [0, 0, 1, 1], [], []>} : vector<8x23xf32>, vector<23x128xf32>, vector<8x128xf32> -> vector<8x128xf32>
    %c0_29 = arith.constant 0 : index
    %c0_30 = arith.constant 0 : index
    %81 = vector.load %arg8[%c0_29, %c0_30] : memref<1x128xf32, #tpu.memory_space<vmem>>, vector<1x128xf32>
    %82 = vector.broadcast %81 : vector<1x128xf32> to vector<8x128xf32>
    %83 = arith.addf %80, %82 : vector<8x128xf32>
    %c0_31 = arith.constant 0 : index
    %c0_32 = arith.constant 0 : index
    %84 = vector.load %arg9[%c0_31, %c0_32] : memref<8x128xf32, #tpu.memory_space<vmem>>, vector<8x128xf32>
    tpu.vector_store %arg9[%c0_31, %c0_32], %83 {strides = array<i32>} : memref<8x128xf32, #tpu.memory_space<vmem>>, vector<8x128xf32>,
    return
  }
  func.func @transform_0(%arg0: i32, %arg1: memref<1xi32, #tpu.memory_space<smem>>) -> (i32, i32) {
    %c0_i32 = arith.constant 0 : i32
    %c0_i32_0 = arith.constant 0 : i32
    return %arg0, %c0_i32 : i32, i32
  }
  func.func @transform_1(%arg0: i32, %arg1: memref<1xi32, #tpu.memory_space<smem>>) -> (i32, i32) {
    %c0_i32 = arith.constant 0 : i32
    %c0_i32_0 = arith.constant 0 : i32
    %c0_i32_1 = arith.constant 0 : i32
    return %c0_i32, %c0_i32_0 : i32, i32
  }
  func.func @transform_2(%arg0: i32, %arg1: memref<1xi32, #tpu.memory_space<smem>>) -> (i32, i32) {
    %c0_i32 = arith.constant 0 : i32
    %c0_i32_0 = arith.constant 0 : i32
    %c0_i32_1 = arith.constant 0 : i32
    return %c0_i32, %c0_i32_0 : i32, i32
  }
  func.func @transform_3(%arg0: i32, %arg1: memref<1xi32, #tpu.memory_space<smem>>) -> (i32, i32) {
    %c0_i32 = arith.constant 0 : i32
    %c0_i32_0 = arith.constant 0 : i32
    %c0_i32_1 = arith.constant 0 : i32
    return %c0_i32, %c0_i32_0 : i32, i32
  }
  func.func @transform_4(%arg0: i32, %arg1: memref<1xi32, #tpu.memory_space<smem>>) -> (i32, i32) {
    %c0_i32 = arith.constant 0 : i32
    %c0_i32_0 = arith.constant 0 : i32
    %c0_i32_1 = arith.constant 0 : i32
    return %c0_i32, %c0_i32_0 : i32, i32
  }
  func.func @transform_5(%arg0: i32, %arg1: memref<1xi32, #tpu.memory_space<smem>>) -> (i32, i32) {
    %c0_i32 = arith.constant 0 : i32
    %c0_i32_0 = arith.constant 0 : i32
    %c0_i32_1 = arith.constant 0 : i32
    return %c0_i32, %c0_i32_0 : i32, i32
  }
  func.func @transform_6(%arg0: i32, %arg1: memref<1xi32, #tpu.memory_space<smem>>) -> (i32, i32) {
    %c0_i32 = arith.constant 0 : i32
    %c0_i32_0 = arith.constant 0 : i32
    %c0_i32_1 = arith.constant 0 : i32
    return %c0_i32, %c0_i32_0 : i32, i32
  }
  func.func @transform_7(%arg0: i32, %arg1: memref<1xi32, #tpu.memory_space<smem>>) -> (i32, i32) {
    %c0_i32 = arith.constant 0 : i32
    %c0_i32_0 = arith.constant 0 : i32
    return %arg0, %c0_i32 : i32, i32
  }
}

</mosaic_0001>

<bundles_post_ra>
// kernel: fcn_forward.1
= control target key start
LH: loop header
LB: loop body
LE: loop exit
PB: predicated region body
PF: predicated region fallthrough
CT: control target
= control target key end

     0   :  { %v461_v3 = vmov 0.0|0.0   ;;  %vm462_vm0 = vmmov 0   ;;  %v463_v6 = vmov 0.0   ;;  %s592_s0 = inlined_call_operand.<no memory space> [shape: s32[1], index: 0, kind: input, shape index: {}]   ;;  %s593_s1 = inlined_call_operand.vmem [shape: f32[8,64], index: 1, kind: input, shape index: {}]   ;;  %s594_s2 = inlined_call_operand.vmem [shape: f32[64,32], index: 2, kind: input, shape index: {}]   ;;  %s595_s3 = inlined_call_operand.vmem [shape: f32[1,32], index: 3, kind: input, shape index: {}]   ;;  %s596_s4 = inlined_call_operand.vmem [shape: f32[32,23], index: 4, kind: input, shape index: {}]   ;;  %s597_s5 = inlined_call_operand.vmem [shape: f32[1,23], index: 5, kind: input, shape index: {}]   ;;  %s598_s6 = inlined_call_operand.vmem [shape: f32[23,128], index: 6, kind: input, shape index: {}]   ;;  %s599_s7 = inlined_call_operand.vmem [shape: f32[1,128], index: 7, kind: input, shape index: {}]   ;;  %s600_s8 = inlined_call_operand.hbm [shape: f32[8,128], index: 8, kind: output, shape index: {}]  }
   0x1   :  { %v32_v0 = vld [vmem:[%s594_s2] sm:$0xff]  ;;  %v33_v1 = vld [vmem:[%s594_s2 + $0x8] sm:$0xff]  ;;  %v34_v2 = vld [vmem:[%s594_s2 + $0x10] sm:$0xff]  ;;  %412 = vmatprep.subr.bf16.mxu0 %v461_v3  ;;  %389 = vmatprep.mubr.msk.f32.mxu0 %vm462_vm0, %v463_v6 }
   0x2   :  { %v413_v4 = vpack.c.bf16 %v33_v1, %v32_v0  ;;  %v35_v5 = vld [vmem:[%s594_s2 + $0x18] sm:$0xff]  ;;  %424 = vmatprep.subr.bf16.mxu1 %v461_v3  ;;  %400 = vmatprep.mubr.msk.f32.mxu1 %vm462_vm0, %v463_v6  ;;  %v145_v8 = vld [vmem:[%s596_s4] sm:$0xff]  ;;  %v146_v9 = vld [vmem:[%s596_s4 + $0x8] sm:$0xff] }
   0x3   :  { %v416_v7 = vpack.c.bf16 %v35_v5, %v34_v2  ;;  %v36_v10 = vld [vmem:[%s594_s2 + $0x20] sm:$0xff]  ;;  %v37_v11 = vld [vmem:[%s594_s2 + $0x28] sm:$0xff]  ;;  %v425_v12 = vpack.c.bf16 %v146_v9, %v145_v8 }
   0x4   :  { %414 = vmatpush3.bf16.msra.mxu0 %v413_v4 }
   0x5   :  { %415 = vmatprep.subr.bf16.mxu0 %v461_v3 }
   0x6   :  { %14 = vsyncpa [#allocation5], 0  ;;  %426 = vmatpush3.bf16.msra.mxu1 %v425_v12  ;;  %v419_v13 = vpack.c.bf16 %v37_v11, %v36_v10  ;;  %v38_v14 = vld [vmem:[%s594_s2 + $0x30] sm:$0xff]  ;;  %v39_v15 = vld [vmem:[%s594_s2 + $0x38] sm:$0xff]  ;;  %vm47_vm1 = vcmask 523264   ;;  %v122_v21 = vlaneseq  ;;  %vm156_vm3 = vcmask 261120  }
   0x7   :  { %427 = vmatprep.subr.bf16.mxu1 %v461_v3  ;;  %v422_v16 = vpack.c.bf16 %v39_v15, %v38_v14  ;;  %v31_v17 = vld [vmem:[%s593_s1] sm:$0xff]  ;;  %v147_v18 = vld [vmem:[%s596_s4 + $0x10] sm:$0xff]  ;;  %v148_v19 = vld [vmem:[%s596_s4 + $0x18] sm:$0xff]  ;;  %s128_s9 = sadd.s32 195935969, %s592_s0  ;;  %vm259_vm4 = vcmask 1046528  }
   0x8   :  { %417 = vmatpush3.bf16.msra.mxu0 %v416_v7  ;;  %v428_v20 = vpack.c.bf16 %v148_v19, %v147_v18  ;;  %v123_v22 = vshrl.u32 %v122_v21, 7  ;;  %v127_v23 = vand.u32 127, %v122_v21  ;;  %v132_v27 = vstv %s128_s9  ;;  %v348_v37 = vld [vmem:[%s595_s3] ss:$0 sm:$0xff]  ;;  %v246_v45 = vld [vmem:[%s598_s6 + $0x8] sm:$0xff]  ;;  %s464_s21 = smov [#allocation4]  }
   0x9   :  { %418 = vmatprep.subr.bf16.mxu0 %v461_v3  ;;  %v245_v44 = vld [vmem:[%s598_s6] sm:$0xff]  ;;  %v247_v47 = vld [vmem:[%s598_s6 + $0x10] sm:$0x7f]  ;;  %s231_s18 = sadd.s32 1592642302, %s592_s0  ;;  %vm255_vm6 = vcmask 187392  }
   0xa   :  { %429 = vmatpush3.bf16.msra.mxu1 %v428_v20  ;;  %v129_v24 = vmul.u32 2654435761, %v123_v22  ;;  %v130_v25 = vmul.u32 2246822519, %v127_v23  ;;  %v431_v46 = vpack.c.bf16 %v246_v45, %v245_v44  ;;  %v232_v48 = vstv %s231_s18  ;;  %v350_v58 = vld [vmem:[%s597_s5] ss:$0 sm:$0xff] }
   0xb   :  { %430 = vmatprep.subr.bf16.mxu1 %v461_v3  ;;  %v352_v1 = vld [vmem:[%s599_s7] ss:$0 sm:$0xff]  ;;  %s340_s22 = sshll.u32 %s464_s21, 4  ;;  %s341_s22 = int_to_ptr.vmem [resolvable:$true] %s340_s22 }
   0xc   :  { %420 = vmatpush3.bf16.msra.mxu0 %v419_v13  ;;  %v131_v26 = vxor.u32 %v130_v25, %v129_v24  ;;  %s437_s5 = scalar_lea.vmem %s341_s22, 128  ;;  %p442_p1 = scmp.lt.s32.totalorder %s341_s22, %s341_s22 }
   0xd   :  { %421 = vmatprep.subr.bf16.mxu0 %v461_v3  ;;  %p438_p0 = scmp.ne.s32.totalorder %s341_s22, %s437_s5  ;;  %p443_p2 = scmp.lt.s32.totalorder %s437_s5, %s437_s5 }
   0xe   :  { %v133_v28 = vadd.s32 %v132_v27, %v131_v26  ;;  %v233_v49 = vadd.s32 %v232_v48, %v131_v26 }
   0xf   :  { %p444_p3 = por %p443_p2, %p442_p1 }
  0x10   :  { %423 = vmatpush3.bf16.msra.mxu0 %v422_v16  ;;  %v134_v29 = vshrl.u32 %v133_v28, 16  ;;  %v234_v50 = vshrl.u32 %v233_v49, 16 }
  0x11   :  { %p445_p4 = pnand %p444_p3, %p438_p0 }
  0x12   :  { %v135_v30 = vxor.u32 %v134_v29, %v133_v28  ;;  %v235_v51 = vxor.u32 %v234_v50, %v233_v49 }
  0x13   :  { %390 = vmatmul.mubr.msk.f32.vlgmr.msra.gmra.mrb[0].mxu0 %vm47_vm1, %v31_v17 }
  0x14   :  { %v136_v31 = vmul.u32 2246822507, %v135_v30  ;;  %v236_v52 = vmul.u32 2246822507, %v235_v51 }
  0x16   :  { %v137_v32 = vshrl.u32 %v136_v31, 13  ;;  %v237_v53 = vshrl.u32 %v236_v52, 13 }
  0x18   :  { %v138_v33 = vxor.u32 %v137_v32, %v136_v31  ;;  %v238_v54 = vxor.u32 %v237_v53, %v236_v52 }
  0x1a   :  { %v139_v34 = vmul.u32 3266489909, %v138_v33  ;;  %v239_v55 = vmul.u32 3266489909, %v238_v54 }
  0x1c   :  { %v140_v35 = vshrl.u32 %v139_v34, 16  ;;  %v240_v56 = vshrl.u32 %v239_v55, 16 }
  0x1e   :  { %v141_v36 = vxor.u32 %v140_v35, %v139_v34  ;;  %v241_v57 = vxor.u32 %v240_v56, %v239_v55 }
  0x20   :  { %v142_v38 = vshrl.u32 %v141_v36, 8  ;;  %v242_v59 = vshrl.u32 %v241_v57, 8 }
  0x22   :  { %vm143_vm2 = vcmp.lt.s32.totalorder %v142_v38, 13421773  ;;  %vm243_vm5 = vcmp.lt.s32.totalorder %v242_v59, 13421773 }
  0xe6   :  { %v117_v39 = vpop.f32.mrb[0].mxu0 }
  0xe7   :  { %v118_v40 = vadd.f32 %v348_v37, %v117_v39  ;;  %v391_v41 = vpop.f32.mrb[1].mxu0 }
  0xe9   :  { %v121_v42 = vmax.f32 %v118_v40, 0.0 }
  0xeb   :  { %v144_v43 = vsel %vm143_vm2, %v121_v42, 0.0 }
  0xec   :  { %401 = vmatmul.mubr.msk.f32.vlgmr.msra.gmra.mrb[0].mxu1 %vm156_vm3, %v144_v43 }
  0xed   :  { %409 = vmatprep.mubr.msk.f32.mxu1 %vm462_vm0, %v463_v6  ;;  %432 = vmatpush3.bf16.msra.mxu1 %v431_v46 }
  0xee   :  { %407 = vmatprep.subr.mxu1 %v463_v6 }
  0xf1   :  { %408 = vmatpush3.msk.msra.mxu1 %vm259_vm4, %v247_v47 }
 0x1bf   :  { %v226_v60 = vpop.f32.mrb[0].mxu1 }
 0x1c0   :  { %v227_v61 = vadd.f32 %v350_v58, %v226_v60  ;;  %v402_v62 = vpop.f32.mrb[1].mxu1 }
 0x1c2   :  { %v230_v63 = vmax.f32 %v227_v61, 0.0 }
 0x1c4   :  { %v244_v0 = vsel %vm243_vm5, %v230_v63, 0.0 }
 0x1c5   :  { %410 = vmatmul.mubr.msk.f32.vlgmr.msra.gmra.mrb[2].mxu1 %vm255_vm6, %v244_v0 }
 0x298   :  { %v329_v2 = vpop.f32.mrb[2].mxu1 }
 0x299   :  { %v330_v3 = vadd.f32 %v352_v1, %v329_v2  ;;  %v411_v4 = vpop.f32.mrb[3].mxu1 }
 0x29b   :  { %333 = vst [vmem:[#allocation4] sm:$0xff] %v330_v3 }
 0x29c   :  { %448 = shalt.err (!%p445_p4)
}
 0x29d   :  { %s449_s25 = scalar_lea.hbm %s600_s8, 128 }
 0x29e   :  { %p450_p5 = scmp.ne.s32.totalorder %s600_s8, %s449_s25  ;;  %p453_p6 = scmp.lt.u32.totalorder %s449_s25, %s600_s8 }
 0x2a0   :  { %p455_p7 = pnand %p453_p6, %p450_p5 }
 0x2a2   :  { %458 = shalt.err (!%p455_p7)
}
 0x2a3   :  { %343 = dma.vmem_to_hbm [thread:$0]  %s341_s22, 128, %s600_s8, [#allocation5]  }
 0x2a4   :  { %459 = dma.done.wait [#allocation5], 128  }
 0x2a5   :  { %460 = vsyncadd [#allocation5], 4294967168 }
 0x2a6   :  { %347 = vsyncpa [#allocation5], 1 }

</bundles_post_ra>
